<compile_context>
chip_gen: v7x
topology: tpu7x:2x2x1
jax: 0.10.0
libtpu: 0.0.40
codegen_flags: <defaults>
</compile_context>

<pallas_src>
import jax
import jax.numpy as jnp
from jax import lax
from jax.experimental import pallas as pl
from jax.experimental.pallas import tpu as pltpu

LANE = 128  # TPU vreg lane width


# -----------------------------------------------------------------------------
# Primary kernel: memory-bound stream (out = 2 * grad, exact for finite inputs).
# -----------------------------------------------------------------------------
def neuralgrad_stream_kernel(g_ref, o_ref):
    g = g_ref[...]                                  # (TM, LANE) lane-dense tile, f32
    p = jnp.float32(1.0)                            # softmax over a size-1 feature axis
    # single unmasked full-tile store
    o_ref[...] = ((p + 1.0) * g).astype(o_ref.dtype)


# -----------------------------------------------------------------------------
# Secondary kernel: faithful per-scalar MLP (optimized per review).
# -----------------------------------------------------------------------------
def neuralgrad_mlp_kernel(g_ref, w1_ref, b1_ref, w2_ref, b2_ref, o_ref):
    # Weights arrive pre-broadcast to lane-dense (H, LANE) f32 slabs (hoisted out of
    # the row loop by the wrapper; JAX does not CSE broadcast_in_dim).
    w1 = w1_ref[...]            # (H, LANE)  Linear(1,H) weight column, lane-broadcast
    b1 = b1_ref[...]            # (H, LANE)  Linear(1,H) bias
    w2 = w2_ref[...]            # (H, LANE)  Linear(H,1) weight column, lane-broadcast
    b2 = b2_ref[...]            # (1, LANE)  Linear(H,1) bias
    tm = g_ref.shape[0]         # static

    def body(r, carry):
        gr = g_ref[pl.ds(r, 1), :]                         # (1, LANE) grad scalars
        # Linear(1, H) + ReLU: pure VPU outer broadcast, (H, LANE) slab
        h = jnp.maximum(gr * w1 + b1, 0.0)
        # Linear(H, 1): VPU multiply + XLU cross-sublane reduction (contract H on
        # sublanes) -- no MXU stationary-operand reload, no bf16 cast churn.
        g1 = jnp.sum(h * w2, axis=0, keepdims=True) + b2   # (1, LANE) f32
        # softmax over the size-1 output-feature axis (dim=-1 in the torch module):
        # max == g1, numerator exp(g1 - g1), denominator is the single-term sum.
        num = jnp.exp(g1 - g1)
        p = num / num                                      # == 1 for finite g1, NaN-preserving
        # NOTE: on v5e these per-row (1, LANE) stores could be batched through a
        # (TM, LANE) VMEM scratch into one unmasked store; kept simple here since the
        # stream kernel is the production path.
        o_ref[pl.ds(r, 1), :] = ((p + 1.0) * gr).astype(o_ref.dtype)
        return carry

    # fori_loop (fully unrolled) bounds the (H, LANE) live range per iteration.
    lax.fori_loop(0, tm, body, 0, unroll=True)


# -----------------------------------------------------------------------------
# Wrappers (layout plumbing: flat grad -> lane-dense (rows, 128) slab).
# -----------------------------------------------------------------------------
def _pick_tile_rows(n_scalars, requested):
    """Multiple-of-8 tile height; prefer >= 2 grid steps so the 'parallel' axis can
    shard across v7x's two TensorCores."""
    rows_needed = max(1, -(-n_scalars // LANE))
    tr = max(8, min(int(requested), rows_needed))
    tr -= tr % 8
    tr = max(8, tr)
    while tr > 8 and -(-rows_needed // tr) < 2:
        tr //= 2
        tr -= tr % 8
        tr = max(8, tr)
    return tr


def _pad_to_slab(flat, tile_rows):
    n = flat.shape[0]
    block = tile_rows * LANE
    pad = (-n) % block
    if pad:
        flat = jnp.pad(flat, (0, pad))   # zero padding is harmless: per-scalar op
    g2d = flat.reshape(-1, LANE)
    return g2d, g2d.shape[0]


def neuralgrad_forward(grad, params=None, *, tile_rows=512):
    """Fast path: exploits the exact size-1 softmax identity (out = 2*grad)."""
    del params  # provably does not affect the output for finite inputs
    orig_shape, orig_dtype = grad.shape, grad.dtype
    flat = grad.reshape(-1).astype(jnp.float32)
    n = flat.shape[0]
    tr = _pick_tile_rows(n, tile_rows)
    g2d, rows = _pad_to_slab(flat, tr)
    grid = (rows // tr,)

    out2d = pl.pallas_call(
        neuralgrad_stream_kernel,
        out_shape=jax.ShapeDtypeStruct((rows, LANE), jnp.float32),
        grid=grid,
        in_specs=[pl.BlockSpec((tr, LANE), lambda i: (i, 0))],
        out_specs=pl.BlockSpec((tr, LANE), lambda i: (i, 0)),
        compiler_params=pltpu.CompilerParams(
            dimension_semantics=("parallel",),
            vmem_limit_bytes=32 * 1024 * 1024,   # well inside v7x's 64 MiB VMEM/TC
        ),
    )(g2d)

    return out2d.reshape(-1)[:n].reshape(orig_shape).astype(orig_dtype)


def neuralgrad_forward_faithful(grad, params, *, tile_rows=8):
    """Executes the per-scalar MLP faithfully (optimized layout / reduction)."""
    orig_shape, orig_dtype = grad.shape, grad.dtype
    flat = grad.reshape(-1).astype(jnp.float32)
    n = flat.shape[0]
    tr = max(8, int(tile_rows) - int(tile_rows) % 8)
    g2d, rows = _pad_to_slab(flat, tr)
    grid = (rows // tr,)

    H = params["w1"].shape[0]
    f32 = jnp.float32
    # Pre-broadcast weights to lane-dense (H, LANE) slabs once, in the wrapper.
    w1_b = jnp.broadcast_to(params["w1"].astype(f32).reshape(H, 1), (H, LANE))
    b1_b = jnp.broadcast_to(params["b1"].astype(f32).reshape(H, 1), (H, LANE))
    w2_b = jnp.broadcast_to(params["w2"].astype(f32).reshape(H, 1), (H, LANE))
    b2_b = jnp.broadcast_to(params["b2"].astype(f32).reshape(1, 1), (1, LANE))

    out2d = pl.pallas_call(
        neuralgrad_mlp_kernel,
        out_shape=jax.ShapeDtypeStruct((rows, LANE), jnp.float32),
        grid=grid,
        in_specs=[
            pl.BlockSpec((tr, LANE), lambda i: (i, 0)),     # grad tile
            pl.BlockSpec((H, LANE), lambda i: (0, 0)),      # constant-index weights:
            pl.BlockSpec((H, LANE), lambda i: (0, 0)),      # fetched once, resident
            pl.BlockSpec((H, LANE), lambda i: (0, 0)),
            pl.BlockSpec((1, LANE), lambda i: (0, 0)),
        ],
        out_specs=pl.BlockSpec((tr, LANE), lambda i: (i, 0)),
        compiler_params=pltpu.CompilerParams(
            dimension_semantics=("parallel",),
            vmem_limit_bytes=32 * 1024 * 1024,
        ),
    )(g2d, w1_b, b1_b, w2_b, b2_b)

    return out2d.reshape(-1)[:n].reshape(orig_shape).astype(orig_dtype)


# -----------------------------------------------------------------------------
# Pure-JAX reference and synthetic params (nn.Linear shapes).
# -----------------------------------------------------------------------------
def neuralgrad_reference(grad, params):
    h = jnp.maximum(grad @ params["w1"].T + params["b1"], 0.0)
    g1 = h @ params["w2"].T + params["b2"]
    p = jax.nn.softmax(g1, axis=-1)
    return p * grad + grad


def init_params(key, hidden_dim=8, alpha=16):
    H = int(alpha * hidden_dim)
    k1, k2, k3, k4 = jax.random.split(key, 4)
    f32 = jnp.float32
    return dict(
        w1=0.5 * jax.random.normal(k1, (H, 1), f32),
        b1=0.5 * jax.random.normal(k2, (H,), f32),
        w2=(1.0 / float(H) ** 0.5) * jax.random.normal(k3, (1, H), f32),
        b2=0.1 * jax.random.normal(k4, (1,), f32),
    )


if __name__ == "__main__":
    key = jax.random.PRNGKey(0)
    kx, kp = jax.random.split(key)

    # Small config: hidden_dim=8, alpha=16 -> H = 128 hidden units; 4096 grad scalars.
    hidden_dim, alpha = 8, 16
    N = 4096
    grad = 0.1 * jax.random.normal(kx, (N, 1), jnp.float32)
    params = init_params(kp, hidden_dim=hidden_dim, alpha=alpha)

    ref = neuralgrad_reference(grad, params)

    # Primary (streaming) kernel.
    out_fast = neuralgrad_forward(grad, params)
    jax.block_until_ready(out_fast)
    assert out_fast.shape == grad.shape
    assert bool(jnp.all(jnp.isfinite(out_fast)))
    assert bool(jnp.allclose(out_fast, ref, atol=1e-5, rtol=1e-5))

    # Faithful MLP kernel (optimized layout), verified against the same reference.
    out_mlp = neuralgrad_forward_faithful(grad, params, tile_rows=8)
    jax.block_until_ready(out_mlp)
    assert out_mlp.shape == grad.shape
    assert bool(jnp.allclose(out_mlp, ref, atol=1e-5, rtol=1e-5))

    print("KERNEL_OK")
</pallas_src>

<mosaic_0001>
module attributes {stable_mosaic.version = 11 : i64} {
  func.func @neuralgrad_stream_kernel(%arg0: i32, %arg1: memref<16x128xf32, #tpu.memory_space<vmem>>, %arg2: memref<16x128xf32, #tpu.memory_space<vmem>>) attributes {dimension_semantics = [#tpu.dimension_semantics<parallel>], iteration_bounds = array<i64: 2>, scalar_prefetch = 0 : i64, scratch_operands = 0 : i64, tpu.core_type = #tpu.core_type<tc>, window_params = [{transform_indices = @transform_0, window_bounds = array<i64: 16, 128>}, {transform_indices = @transform_1, window_bounds = array<i64: 16, 128>}]} {
    %c0 = arith.constant 0 : index
    %c0_0 = arith.constant 0 : index
    %0 = vector.load %arg1[%c0, %c0_0] : memref<16x128xf32, #tpu.memory_space<vmem>>, vector<16x128xf32>
    %cst = arith.constant 1.000000e+00 : f32
    %cst_1 = arith.constant 1.000000e+00 : f32
    %1 = arith.addf %cst, %cst_1 : f32
    %2 = vector.broadcast %1 : f32 to vector<16x128xf32>
    %3 = arith.mulf %2, %0 : vector<16x128xf32>
    %c0_2 = arith.constant 0 : index
    %c0_3 = arith.constant 0 : index
    %4 = vector.load %arg2[%c0_2, %c0_3] : memref<16x128xf32, #tpu.memory_space<vmem>>, vector<16x128xf32>
    tpu.vector_store %arg2[%c0_2, %c0_3], %3 {strides = array<i32>} : memref<16x128xf32, #tpu.memory_space<vmem>>, vector<16x128xf32>,
    return
  }
  func.func @transform_0(%arg0: i32) -> (i32, i32) {
    %c0_i32 = arith.constant 0 : i32
    %c0_i32_0 = arith.constant 0 : i32
    return %arg0, %c0_i32 : i32, i32
  }
  func.func @transform_1(%arg0: i32) -> (i32, i32) {
    %c0_i32 = arith.constant 0 : i32
    %c0_i32_0 = arith.constant 0 : i32
    return %arg0, %c0_i32 : i32, i32
  }
}

</mosaic_0001>

<bundles_post_ra>
// kernel: tpu_custom_call.1
= control target key start
LH: loop header
LB: loop body
LE: loop exit
PB: predicated region body
PF: predicated region fallthrough
CT: control target
= control target key end

     0   :  { %6 = vsyncpa [#allocation3], 0  ;;  %s572_s0 = inlined_call_operand.hbm [shape: f32[32,128], index: 0, kind: input, shape index: {}]   ;;  %s573_s1 = inlined_call_operand.hbm [shape: f32[32,128], index: 1, kind: output, shape index: {}]  }
   0x1   :  { %8 = vsyncpa [#allocation3 + $0x1], 0 }
   0x2   :  { %9 = vsyncpa [#allocation4], 0 }
   0x3   :  { %11 = vsyncpa [#allocation4 + $0x1], 0  ;;  %s410_s6 = smov 0   ;;  %s412_s7 = smov 0  }
   0x4   :  { %s414_s8 = smov 0   ;;  %s416_s9 = smov 0  }
   0x5 LB: > { %s431_s10 = sadd.s32 4294967295, %s392_s9   ;;  %s230_s11 = sadd.s32 4294967294, %s392_s9   ;;  %s392_s9 = sphi %s416_s9, %s586_s9   ;;  %s388_s8 = sphi %s414_s8, %s585_s8   ;;  %s384_s7 = sphi %s412_s7, %s584_s7   ;;  %s380_s6 = sphi %s410_s6, %s583_s6  }
   0x6   : > { %s435_s12 = sadd.s32 1, %s392_s9   ;;  %s24_s13 = sadd.s32 1, %s388_s8 }
   0x7   : > { %s21_s14 = ssub.s32 %s392_s9, %s435_s12  ;;  %p31_p0 = scmp.ne.s32.totalorder %s388_s8, %s384_s7 }
   0x8   : > { %p22_p1 = scmp.eq.s32.totalorder %s21_s14, 0  ;;  %p32_p2 = scmp.eq.s32.totalorder %s392_s9, 0 }
   0x9   : > { %p37_p3 = scmp.ne.s32.totalorder %s384_s7, %s380_s6  ;;  %p38_p4 = scmp.eq.s32.totalorder %s431_s10, 0 }
   0xa   : > { %s447_s15 = scalar_select %p22_p1, %s388_s8, %s24_s13  }
   0xb   : > { %p449_p5 = por %p32_p2, %p31_p0  ;;  %p453_p6 = por %p38_p4, %p37_p3 }
   0xc   : > { %p61_p7 = scmp.eq.s32.totalorder %s431_s10, 1  ;;  %p67_p8 = scmp.eq.s32.totalorder %s230_s11, 1 }
   0xd   : > { %p258_p10 = scmp.lt.s32.totalorder %s392_s9, 2  ;;  %s87_s20 = sand.u32 1, %s388_s8  }
   0xe   : > { %p460_p11 = por %p61_p7, %p31_p0  ;;  %p464_p12 = por %p67_p8, %p37_p3 }
   0xf   : > { %s244_s21 = sshll.u32 %s392_s9, 8  ;;  %s233_s22 = sshll.u32 %s87_s20, 4 }
  0x10   : > { %s577_s18 = scalar_select %p460_p11, 1, 0 }
  0x11   : > { %s578_s19 = scalar_select %p464_p12, 1, 0 }
  0x12   : > { %s473_s25 = scalar_lea.hbm %s572_s0, %s244_s21  ;;  %s91_s26 = scalar_lea.vmem [#allocation2], %s233_s22 }
  0x13   : > { %s98_s27 = sshll.u32 %s91_s26, 4  ;;  %p477_p13 = pnand %p258_p10, %p449_p5  ;;  %s481_s27 = int_to_ptr.vmem [resolvable:$true] %s98_s27 }
  0x14   : > { %s483_s29 = scalar_lea.sflag [#allocation3], %s87_s20  ;;  %s296_s30 = scalar_lea.hbm %s473_s25, 256 }
  0x15   : > { %p297_p0 = scmp.ne.s32.totalorder %s473_s25, %s296_s30  ;;  %p298_p1 = pneg %p477_p13 }
  0x16   : > { %s301_s4 = scalar_lea.hbm %s572_s0, 512  ;;  %p302_p4 = scmp.lt.u32.totalorder %s473_s25, %s572_s0 }
  0x17   : > { %p299_p2 = pnand %p298_p1, %p297_p0  ;;  %p303_p5 = scmp.lt.u32.totalorder %s301_s4, %s296_s30 }
  0x18   : > { %p305_p8 = scmp.lt.u32.totalorder %s296_s30, %s473_s25 }
  0x19   : > { %p300_p3 = pneg %p299_p2  ;;  %p304_p7 = por %p303_p5, %p302_p4 }
  0x1b   : > { %p306_p10 = por %p305_p8, %p304_p7 }
  0x1d   : > { %p307_p9 = pnand %p306_p10, %p300_p3 }
  0x1f   : > { %310 = shalt.err (!%p307_p9)
}
  0x20   : > { %s311_s13 = scalar_lea.vmem %s481_s27, 256  ;;  %s394_s14 = smov [#allocation2]  }
  0x21   : > { %p312_p0 = scmp.ne.s32.totalorder %s481_s27, %s311_s13  ;;  %s316_s16 = sshll.u32 %s394_s14, 4  ;;  %s317_s16 = int_to_ptr.vmem [resolvable:$false] %s316_s16 }
  0x22   : > { %s318_s20 = scalar_lea.vmem %s317_s16, 512  ;;  %p319_p11 = scmp.lt.s32.totalorder %s481_s27, %s317_s16 }
  0x23   : > { %p314_p2 = pnand %p312_p0, %p298_p1  ;;  %p320_p4 = scmp.lt.s32.totalorder %s318_s20, %s311_s13 }
  0x25   : > { %p315_p12 = pneg %p314_p2  ;;  %p321_p5 = por %p320_p4, %p319_p11 }
  0x27   : > { %p322_p7 = pnand %p321_p5, %p315_p12 }
  0x29   : > { %325 = shalt.err (!%p322_p7)
}
  0x2a   : > { %s395_s21 = smov 128   ;;  %s396_s22 = smov 8  }
  0x2b   : > { %253 = dma.hbm_to_vmem [thread:$0]  (!%p477_p13), %s473_s25, 256, %s481_s27, %s483_s29, %s395_s21, %s395_s21, %s396_s22  }
  0x2c   : > { %p236_p9 = scmp.ge.s32.totalorder %s392_s9, 1  ;;  %p106_p1 = scmp.lt.s32.totalorder %s392_s9, 3 }
  0x2e   : > { %p107_p3 = pnand %p236_p9, %p106_p1 }
  0x2f   : > { %s514_s23 = sand.u32 (!%p107_p3), 1, %s384_s7  }
  0x30   : > { %110 = sbr.rel (%p107_p3) target bundleno = 83 (0x53), region = 24  ;;  %s237_s24 = sshll.u32 (!%p107_p3), %s514_s23, 4 }
  0x31   : > { %s113_s26 = scalar_lea.sflag (!%p107_p3), [#allocation3], %s514_s23  ;;  %s116_s30 = scalar_lea.vmem (!%p107_p3), [#allocation2], %s237_s24 }
  0x37   : > { %371 = dma.done.wait (%p453_p6), %s113_s26, 256  }
  0x38   : > { %373 = vsyncadd (%p453_p6), %s113_s26, 4294967040  ;;  %s134_s25 = scalar_lea.vmem [#allocation5], %s237_s24  ;;  %s245_s28 = sshll.u32 %s431_s10, 8  ;;  %v137_v0 = vld [vmem:[%s116_s30] sm:$0xff]  ;;  %v138_v1 = vld [vmem:[%s116_s30 + $0x8] sm:$0xff] }
  0x39   : > { %s157_s27 = sshll.u32 %s134_s25, 4  ;;  %s528_s3 = scalar_lea.hbm %s573_s1, %s245_s28  ;;  %v139_v2 = vmul.f32 2.0, %v137_v0  ;;  %v140_v3 = vmul.f32 2.0, %v138_v1  ;;  %s523_s27 = int_to_ptr.vmem [resolvable:$true] %s157_s27 }
  0x3a   : > { %s144_s17 = scalar_lea.sflag [#allocation4], %s514_s23  ;;  %s326_s4 = scalar_lea.vmem %s523_s27, 256 }
  0x3b   : > { %141 = vst [vmem:[%s134_s25] sm:$0xff] %v139_v2  ;;  %142 = vst [vmem:[%s134_s25 + $0x8] sm:$0xff] %v140_v3  ;;  %p327_p6 = scmp.ne.s32.totalorder %s523_s27, %s326_s4  ;;  %p580_p11 = scmp.ne.s32.totalorder %s577_s18, 0 }
  0x3c   : > { %s397_s10 = smov [#allocation5]  }
  0x3d   : > { %p328_p12 = pnand %p327_p6, %p580_p11  ;;  %s330_s5 = sshll.u32 %s397_s10, 4  ;;  %s331_s5 = int_to_ptr.vmem [resolvable:$false] %s330_s5 }
  0x3e   : > { %s332_s11 = scalar_lea.vmem %s331_s5, 512  ;;  %p333_p8 = scmp.lt.s32.totalorder %s523_s27, %s331_s5 }
  0x3f   : > { %p329_p13 = pneg %p328_p12  ;;  %p334_p10 = scmp.lt.s32.totalorder %s332_s11, %s326_s4 }
  0x41   : > { %p335_p0 = por %p334_p10, %p333_p8 }
  0x43   : > { %p336_p2 = pnand %p335_p0, %p329_p13 }
  0x45   : > { %339 = shalt.err (!%p336_p2)
}
  0x46   : > { %s340_s13 = scalar_lea.hbm %s528_s3, 256  ;;  %s344_s20 = scalar_lea.hbm %s573_s1, 512 }
  0x47   : > { %p341_p4 = scmp.ne.s32.totalorder %s528_s3, %s340_s13  ;;  %p345_p9 = scmp.lt.u32.totalorder %s528_s3, %s573_s1 }
  0x48   : > { %p346_p1 = scmp.lt.u32.totalorder %s344_s20, %s340_s13  ;;  %p348_p6 = scmp.lt.u32.totalorder %s340_s13, %s528_s3 }
  0x49   : > { %p342_p5 = pnand %p341_p4, %p580_p11 }
  0x4a   : > { %p347_p3 = por %p346_p1, %p345_p9 }
  0x4b   : > { %p343_p7 = pneg %p342_p5 }
  0x4c   : > { %p349_p12 = por %p348_p6, %p347_p3 }
  0x4e   : > { %p350_p13 = pnand %p349_p12, %p343_p7 }
  0x50   : > { %353 = shalt.err (!%p350_p13)
}
  0x51   : > { %s398_s24 = smov 128   ;;  %s399_s26 = smov 8  }
  0x52   : > { %248 = dma.vmem_to_hbm [thread:$0]  (%p580_p11), %s523_s27, 256, %s528_s3, %s144_s17, %s398_s24, %s398_s24, %s399_s26  }
  0x53 PF: > { %s172_s30 = sand.u32 1, %s380_s6   ;;  %p581_p8 = scmp.ne.s32.totalorder %s578_s19, 0 }
  0x54   : > { %p582_p10 = scmp.ge.s32.totalorder %s392_s9, 2  ;;  %s173_s25 = scalar_lea.sflag [#allocation4], %s172_s30 }
  0x56   : > { %p255_p0 = pnand %p582_p10, %p581_p8 }
  0x58   : > { %375 = dma.done.wait (!%p255_p0), %s173_s25, 256  }
  0x59   : > { %377 = vsyncadd (!%p255_p0), %s173_s25, 4294967040  ;;  %p14_p2 = scmp.ge.s32.totalorder %s435_s12, 4   ;;  %s583_s6 = smov %s384_s7 }
  0x5a   : > { %s584_s7 = smov %s388_s8  ;;  %s585_s8 = smov %s447_s15 }
  0x5b   : > { %s586_s9 = smov %s435_s12  ;;  %16 = sbr.rel (!%p14_p2) target bundleno = 5 (0x5), region = 69 }
  0x62   :  { %178 = vsyncpa [#allocation3], 1 }
  0x63   :  { %180 = vsyncpa [#allocation3 + $0x1], 1 }
  0x64   :  { %181 = vsyncpa [#allocation4], 1 }
  0x65   :  { %183 = vsyncpa [#allocation4 + $0x1], 1 }

</bundles_post_ra>
